<compile_context>
chip_gen: v5e
topology: v5e:2x2
jax: 0.10.0
libtpu: 0.0.40
codegen_flags: <defaults>
</compile_context>

<pallas_src>
import functools
import math

import jax
import jax.numpy as jnp
from jax.experimental import pallas as pl
from jax.experimental.pallas import tpu as pltpu

_INV_SQRT2 = 1.0 / math.sqrt(2.0)
_SQRT_2_OVER_PI = math.sqrt(2.0 / math.pi)

_SUBLANE_MULT = 32                  # row-tile multiple: covers f32(8)/bf16(16)/int8(32) packing
_TARGET_TILE_BYTES = 2 * 1024 * 1024  # ~2 MiB per buffer (in+out double-buffered -> ~8 MiB VMEM)
_MIN_SPLIT_BYTES = 1 * 1024 * 1024    # above this, force a multi-step grid (megacore + pipelining)
_MIN_GRID_STEPS = 4                   # >= 2 * num TensorCores on v7x


def _gelu_kernel(x_ref, o_ref, *, approximate: bool):
    # Compute in f32 for accuracy regardless of I/O dtype.
    x = x_ref[...].astype(jnp.float32)
    if approximate:
        # tanh-form GELU: transcendental runs on the EUP slot (frees VALU on v7x / bf16-v6e).
        inner = _SQRT_2_OVER_PI * (x + 0.044715 * (x * x * x))
        y = 0.5 * x * (1.0 + jnp.tanh(inner))
    else:
        # exact GELU: x * 0.5 * (1 + erf(x / sqrt(2))) -- matches torch.nn.functional.gelu default
        y = x * 0.5 * (1.0 + jax.lax.erf(x * _INV_SQRT2))
    o_ref[...] = y.astype(o_ref.dtype)


def _gelu_jax(x: jax.Array, approximate: bool) -> jax.Array:
    xf = x.astype(jnp.float32)
    if approximate:
        inner = _SQRT_2_OVER_PI * (xf + 0.044715 * (xf * xf * xf))
        y = 0.5 * xf * (1.0 + jnp.tanh(inner))
    else:
        y = xf * 0.5 * (1.0 + jax.lax.erf(xf * _INV_SQRT2))
    return y.astype(x.dtype)


def _choose_lane_width(n: int) -> int:
    """Widest lane-dense width (multiple of 128, <= 4096) dividing n; 0 if none."""
    for lane in (4096, 2048, 1024, 512, 256, 128):
        if n % lane == 0:
            return lane
    return 0


def _choose_row_tile(rows: int, lanes: int, itemsize: int) -> int:
    """Row-tile size from a per-buffer byte budget, forcing a multi-step grid when non-trivial."""
    total_bytes = rows * lanes * itemsize
    row_bytes = lanes * itemsize
    tm = max(_TARGET_TILE_BYTES // row_bytes, 1)
    if total_bytes > _MIN_SPLIT_BYTES:
        # Keep >= _MIN_GRID_STEPS grid steps so both v7x TensorCores get work and the
        # in/out double-buffer pipeline overlaps DMA with compute.
        tm = min(tm, pl.cdiv(rows, _MIN_GRID_STEPS))
    if tm >= rows:
        return rows  # full-extent block along rows is always legal
    return max((tm // _SUBLANE_MULT) * _SUBLANE_MULT, 8)


def _run_2d(x2d: jax.Array, approximate: bool) -> jax.Array:
    rows, lanes = x2d.shape
    itemsize = jnp.dtype(x2d.dtype).itemsize
    tm = _choose_row_tile(rows, lanes, itemsize)
    n = rows * lanes

    kernel = functools.partial(_gelu_kernel, approximate=approximate)
    return pl.pallas_call(
        kernel,
        out_shape=jax.ShapeDtypeStruct((rows, lanes), x2d.dtype),
        grid_spec=pltpu.PrefetchScalarGridSpec(
            num_scalar_prefetch=0,
            grid=(pl.cdiv(rows, tm),),
            in_specs=[pl.BlockSpec((tm, lanes), lambda i: (i, 0))],
            out_specs=pl.BlockSpec((tm, lanes), lambda i: (i, 0)),
        ),
        compiler_params=pltpu.CompilerParams(
            dimension_semantics=("parallel",),
        ),
        cost_estimate=pl.CostEstimate(
            flops=4 * n,
            transcendentals=n,
            bytes_accessed=2 * n * itemsize,
        ),
    )(x2d)


def gelu_pallas(x: jax.Array, approximate: bool = False) -> jax.Array:
    """GELU forward (default: exact erf, matching torch.nn.functional.gelu / GELUActivation)."""
    orig_shape = x.shape
    n = x.size
    if n == 0:
        return x

    lane = _choose_lane_width(n)
    if lane:
        # Fast path: metadata-only reshape to a lane-dense slab, no padding.
        x2d = x.reshape(n // lane, lane)
        return _run_2d(x2d, approximate).reshape(orig_shape)

    # Rare path: element count not a multiple of 128.
    # Run the 128-aligned prefix through the kernel; compute the (<128-element) tail in
    # plain JAX.  No jnp.pad / full-tensor slice passes.
    x_flat = x.reshape(-1)
    n_main = (n // 128) * 128
    if n_main == 0:
        return _gelu_jax(x_flat, approximate).reshape(orig_shape)
    main = _run_2d(x_flat[:n_main].reshape(n_main // 128, 128), approximate).reshape(-1)
    tail = _gelu_jax(x_flat[n_main:], approximate)
    return jnp.concatenate([main, tail]).reshape(orig_shape)


def gelu_reference(x: jax.Array) -> jax.Array:
    xf = x.astype(jnp.float32)
    return (xf * 0.5 * (1.0 + jax.lax.erf(xf * _INV_SQRT2))).astype(x.dtype)


if __name__ == "__main__":
    key = jax.random.PRNGKey(0)

    # GELUActivation is elementwise; hidden-states-like small shape (primary test).
    x = jax.random.normal(key, (2, 4, 16, 16), dtype=jnp.float32)
    out = gelu_pallas(x)
    jax.block_until_ready(out)
    ref = gelu_reference(x)
    assert out.shape == x.shape and out.dtype == x.dtype
    assert jnp.allclose(out, ref, atol=1e-5, rtol=1e-5)

    # bf16 input: byte-based tile sizing path.
    xb = jax.random.normal(jax.random.PRNGKey(1), (2, 8, 256), dtype=jnp.bfloat16)
    outb = gelu_pallas(xb)
    jax.block_until_ready(outb)
    assert outb.dtype == jnp.bfloat16
    assert jnp.allclose(outb.astype(jnp.float32),
                        gelu_reference(xb).astype(jnp.float32), atol=2e-2, rtol=2e-2)

    # Multi-step grid path (> 1 MiB tensor -> >= 4 grid steps, parallel axis).
    xm = jax.random.normal(jax.random.PRNGKey(2), (8, 512, 1024), dtype=jnp.float32)
    outm = gelu_pallas(xm)
    jax.block_until_ready(outm)
    assert jnp.allclose(outm, gelu_reference(xm), atol=1e-5, rtol=1e-5)

    # Odd element counts: 128-aligned prefix through the kernel + tiny JAX tail,
    # and a fully sub-128 tensor (pure JAX tail path).
    for shape in ((3, 5, 11), (3, 5, 7)):
        xo = jax.random.normal(jax.random.PRNGKey(3), shape, dtype=jnp.float32)
        outo = gelu_pallas(xo)
        jax.block_until_ready(outo)
        assert jnp.allclose(outo, gelu_reference(xo), atol=1e-5, rtol=1e-5)

    # Optional tanh-approximate variant (EUP transcendental) -- looser tolerance vs exact erf.
    outa = gelu_pallas(x, approximate=True)
    jax.block_until_ready(outa)
    assert jnp.allclose(outa, ref, atol=2e-3, rtol=2e-3)

    print("KERNEL_OK")
</pallas_src>

<mosaic_0001>
module attributes {stable_mosaic.version = 11 : i64} {
  func.func @_gelu_kernel(%arg0: i32, %arg1: memref<1x2048xf32, #tpu.memory_space<vmem>>, %arg2: memref<1x2048xf32, #tpu.memory_space<vmem>>) attributes {dimension_semantics = [#tpu.dimension_semantics<parallel>], iteration_bounds = array<i64: 1>, scalar_prefetch = 0 : i64, scratch_operands = 0 : i64, tpu.core_type = #tpu.core_type<tc>, window_params = [{transform_indices = @transform_0, window_bounds = array<i64: 1, 2048>}, {transform_indices = @transform_1, window_bounds = array<i64: 1, 2048>}]} {
    %c0 = arith.constant 0 : index
    %c0_0 = arith.constant 0 : index
    %0 = vector.load %arg1[%c0, %c0_0] : memref<1x2048xf32, #tpu.memory_space<vmem>>, vector<1x2048xf32>
    %cst = arith.constant 5.000000e-01 : f32
    %1 = vector.broadcast %cst : f32 to vector<1x2048xf32>
    %2 = arith.mulf %0, %1 : vector<1x2048xf32>
    %cst_1 = arith.constant 0.707106769 : f32
    %3 = vector.broadcast %cst_1 : f32 to vector<1x2048xf32>
    %4 = arith.mulf %0, %3 : vector<1x2048xf32>
    %5 = math.erf %4 : vector<1x2048xf32>
    %cst_2 = arith.constant 1.000000e+00 : f32
    %6 = vector.broadcast %cst_2 : f32 to vector<1x2048xf32>
    %7 = arith.addf %6, %5 : vector<1x2048xf32>
    %8 = arith.mulf %2, %7 : vector<1x2048xf32>
    %c0_3 = arith.constant 0 : index
    %c0_4 = arith.constant 0 : index
    %9 = vector.load %arg2[%c0_3, %c0_4] : memref<1x2048xf32, #tpu.memory_space<vmem>>, vector<1x2048xf32>
    tpu.vector_store %arg2[%c0_3, %c0_4], %8 {strides = array<i32>} : memref<1x2048xf32, #tpu.memory_space<vmem>>, vector<1x2048xf32>,
    return
  }
  func.func @transform_0(%arg0: i32) -> (i32, i32) {
    %c0_i32 = arith.constant 0 : i32
    %c0_i32_0 = arith.constant 0 : i32
    return %arg0, %c0_i32 : i32, i32
  }
  func.func @transform_1(%arg0: i32) -> (i32, i32) {
    %c0_i32 = arith.constant 0 : i32
    %c0_i32_0 = arith.constant 0 : i32
    return %arg0, %c0_i32 : i32, i32
  }
}

</mosaic_0001>

<bundles_post_ra>
// kernel: tpu_custom_call.1
= control target key start
LH: loop header
LB: loop body
LE: loop exit
PB: predicated region body
PF: predicated region fallthrough
CT: control target
= control target key end

     0   :  { %6 = vsyncpa [#allocation3], 0  ;;  %s228_s0 = inlined_call_operand.hbm [shape: f32[1,2048], index: 0, kind: input, shape index: {}]   ;;  %s229_s1 = inlined_call_operand.hbm [shape: f32[1,2048], index: 1, kind: output, shape index: {}]  }
   0x1   :  { %7 = vsyncpa [#allocation4], 0  ;;  %s13_s8 = sshll.u32 %s228_s0, 4  ;;  %s192_s9 = smov [#allocation2]   ;;  %s14_s8 = int_to_ptr.hbm [resolvable:$true] %s13_s8 }
   0x2   :  { %s15_s10 = sshll.u32 %s192_s9, 4  ;;  %s16_s10 = int_to_ptr.vmem [resolvable:$true] %s15_s10 }
   0x3   :  { %18 = dma.hbm_to_vmem [thread:$0]  %s14_s8, 256, %s16_s10, [#allocation3]  }
   0x4   :  { %188 = dma.done.wait [#allocation3], 256  }
   0x5   :  { %189 = vsyncadd [#allocation3], 4294967040  ;;  %v207_v0 = vld [vmem:[#allocation2] sm:$0xff]  ;;  %v209_v1 = vld [vmem:[#allocation2 + $0x8] sm:$0xff]  ;;  %s193_s0 = smov [#allocation5]   ;;  %s122_s14 = sshll.u32 %s229_s1, 4  ;;  %s123_s14 = int_to_ptr.hbm [resolvable:$true] %s122_s14 }
   0x6   :  { %v212_v2 = vmul.f32 0.70710677, %v207_v0  ;;  %v215_v3 = vmul.f32 0.70710677, %v209_v1  ;;  %s120_s11 = sshll.u32 %s193_s0, 4  ;;  %s121_s11 = int_to_ptr.vmem [resolvable:$true] %s120_s11 }
   0x8   :  { %v29_v4 = vmul.f32 %v212_v2, %v212_v2  ;;  %v69_v5 = vmul.f32 %v215_v3, %v215_v3 }
   0xa   :  { %v30_v6 = vmin.f32 %v29_v4, 16.0  ;;  %v70_v7 = vmin.f32 %v69_v5, 16.0 }
   0xc   :  { %v31_v8 = vmul.f32 2.1237322e-06, %v30_v6  ;;  %v42_v9 = vmul.f32 3.8918573e-05, %v30_v6  ;;  %v71_v10 = vmul.f32 2.1237322e-06, %v70_v7 }
   0xd   :  { %v82_v11 = vmul.f32 3.8918573e-05, %v70_v7 }
   0xe   :  { %v32_v12 = vadd.f32 0.00028619796, %v31_v8  ;;  %v43_v13 = vadd.f32 0.001143296, %v42_v9  ;;  %v72_v14 = vadd.f32 0.00028619796, %v71_v10 }
   0xf   :  { %v83_v15 = vadd.f32 0.001143296, %v82_v11 }
  0x10   :  { %v33_v16 = vmul.f32 %v32_v12, %v30_v6  ;;  %v44_v17 = vmul.f32 %v43_v13, %v30_v6  ;;  %v73_v18 = vmul.f32 %v72_v14, %v70_v7  ;;  %v25_v12 = vmul.f32 0.5, %v207_v0 }
  0x11   :  { %v84_v19 = vmul.f32 %v83_v15, %v70_v7  ;;  %v26_v14 = vmul.f32 0.5, %v209_v1 }
  0x12   :  { %v34_v20 = vadd.f32 0.0036580483, %v33_v16  ;;  %v45_v21 = vadd.f32 0.014752088, %v44_v17  ;;  %v74_v22 = vadd.f32 0.0036580483, %v73_v18 }
  0x13   :  { %v85_v23 = vadd.f32 0.014752088, %v84_v19 }
  0x14   :  { %v35_v24 = vmul.f32 %v34_v20, %v30_v6  ;;  %v46_v25 = vmul.f32 %v45_v21, %v30_v6  ;;  %v75_v26 = vmul.f32 %v74_v22, %v70_v7 }
  0x15   :  { %v86_v27 = vmul.f32 %v85_v23, %v70_v7 }
  0x16   :  { %v47_v28 = vadd.f32 0.112945676, %v46_v25  ;;  %v36_v29 = vadd.f32 0.05243302, %v35_v24  ;;  %v76_v32 = vadd.f32 0.05243302, %v75_v26 }
  0x17   :  { %v87_v30 = vadd.f32 0.112945676, %v86_v27 }
  0x18   :  { %v48_v31 = vmul.f32 %v47_v28, %v30_v6  ;;  %v37_v35 = vmul.f32 %v36_v29, %v30_v6  ;;  %v77_v38 = vmul.f32 %v76_v32, %v70_v7 }
  0x19   :  { %v88_v33 = vmul.f32 %v87_v30, %v70_v7 }
  0x1a   :  { %v49_v34 = vadd.f32 0.4994258, %v48_v31  ;;  %v38_v41 = vadd.f32 0.18741608, %v37_v35  ;;  %v78_v43 = vadd.f32 0.18741608, %v77_v38 }
  0x1b   :  { %v89_v36 = vadd.f32 0.4994258, %v88_v33 }
  0x1c   :  { %v50_v37 = vmul.f32 %v49_v34, %v30_v6  ;;  %v39_v44 = vmul.f32 %v38_v41, %v30_v6  ;;  %v79_v45 = vmul.f32 %v78_v43, %v70_v7 }
  0x1d   :  { %v90_v39 = vmul.f32 %v89_v36, %v70_v7 }
  0x1e   :  { %v51_v40 = vadd.f32 1.0, %v50_v37  ;;  %v40_v48 = vadd.f32 1.1283791, %v39_v44  ;;  %v80_v51 = vadd.f32 1.1283791, %v79_v45 }
  0x1f   :  { %v91_v42 = vadd.f32 1.0, %v90_v39 }
  0x20   :  { %136 = vrcp.f32 %v51_v40  ;;  %vm57_vm0 = vweird.f32 %v51_v40  ;;  %v63_v50 = vand.u32 2147483648, %v51_v40  ;;  %v61_v54 = vand.u32 2147483647, %v51_v40 }
  0x21   :  { %138 = vrcp.f32 %v91_v42  ;;  %v103_v55 = vand.u32 2147483648, %v91_v42  ;;  %vm97_vm2 = vweird.f32 %v91_v42  ;;  %v101_v57 = vand.u32 2147483647, %v91_v42 }
  0x22   :  { %v64_v59 = vor.u32 1.1754944e-38, %v63_v50  ;;  %v41_v61 = vmul.f32 %v40_v48, %v212_v2  ;;  %vm62_vm5 = vcmp.eq.f32.partialorder %v61_v54, 8.507059e+37  ;;  %v81_v4 = vmul.f32 %v80_v51, %v215_v3 }
  0x23   :  { %v104_v63 = vor.u32 1.1754944e-38, %v103_v55  ;;  %vm102_vm7 = vcmp.eq.f32.partialorder %v101_v57, 8.507059e+37 }
  0x26   :  { %v137_v46 = vpop.eup %136 }
  0x27   :  { %v139_v47 = vpop.eup %138  ;;  %v53_v49 = vmul.f32 %v137_v46, %v51_v40  ;;  %vm58_vm1 = vweird.f32 %v137_v46 }
  0x28   :  { %v93_v52 = vmul.f32 %v139_v47, %v91_v42  ;;  %vm98_vm3 = vweird.f32 %v139_v47  ;;  %vm59_vm4 = vmor %vm57_vm0, %vm58_vm1 }
  0x29   :  { %v54_v53 = vsub.f32 1.0, %v53_v49  ;;  %vm99_vm6 = vmor %vm97_vm2, %vm98_vm3 }
  0x2a   :  { %v94_v56 = vsub.f32 1.0, %v93_v52 }
  0x2b   :  { %v55_v58 = vmul.f32 %v137_v46, %v54_v53 }
  0x2c   :  { %v95_v60 = vmul.f32 %v139_v47, %v94_v56 }
  0x2d   :  { %v56_v62 = vadd.f32 %v137_v46, %v55_v58 }
  0x2e   :  { %v96_v5 = vadd.f32 %v139_v47, %v95_v60 }
  0x2f   :  { %v60_v6 = vsel %vm59_vm4, %v137_v46, %v56_v62 }
  0x30   :  { %v65_v7 = vsel %vm62_vm5, %v64_v59, %v60_v6  ;;  %v100_v8 = vsel %vm99_vm6, %v139_v47, %v96_v5 }
  0x31   :  { %v66_v9 = vmul.f32 %v65_v7, %v41_v61  ;;  %v105_v10 = vsel %vm102_vm7, %v104_v63, %v100_v8 }
  0x32   :  { %v106_v11 = vmul.f32 %v105_v10, %v81_v4 }
  0x33   :  { %v132_v13 = vclamps-f32 %v66_v9, 1.0 }
  0x34   :  { %v133_v2 = vclamps-f32 %v106_v11, 1.0 }
  0x35   :  { %v109_v15 = vadd.f32 1.0, %v132_v13 }
  0x36   :  { %v110_v3 = vadd.f32 1.0, %v133_v2 }
  0x37   :  { %v111_v16 = vmul.f32 %v109_v15, %v25_v12 }
  0x38   :  { %v112_v17 = vmul.f32 %v110_v3, %v26_v14 }
  0x39   :  { %113 = vst [vmem:[#allocation5] sm:$0xff] %v111_v16 }
  0x3a   :  { %114 = vst [vmem:[#allocation5 + $0x8] sm:$0xff] %v112_v17 }
  0x3b   :  { %125 = dma.vmem_to_hbm [thread:$0]  %s121_s11, 256, %s123_s14, [#allocation4]  }
  0x3c   :  { %190 = dma.done.wait [#allocation4], 256  }
  0x3d   :  { %191 = vsyncadd [#allocation4], 4294967040 }
  0x3e   :  { %130 = vsyncpa [#allocation3], 1 }
  0x3f   :  { %131 = vsyncpa [#allocation4], 1 }

</bundles_post_ra>
